<compile_context>
chip_gen: v7x
topology: tpu7x:2x2x1
jax: 0.10.0
libtpu: 0.0.40
codegen_flags: <defaults>
</compile_context>

<pallas_src>
import functools
import numpy as np
import jax
import jax.numpy as jnp
from jax.experimental import pallas as pl
from jax.experimental.pallas import tpu as pltpu

NUM_CLASSES = 2          # module-level `num_classes` in the reference file
BN_EPS = 1e-5
GROUPS = 32
LANE = 128


def _round_up(x, m):
    return ((x + m - 1) // m) * m


def _pick_tm(M, cap=512):
    """Pick a row tile <= cap, preferring an exact divisor of M (no padding)."""
    if M <= cap:
        return M, M
    for tm in range(cap, 127, -8):
        if M % tm == 0:
            return tm, M
    return cap, _round_up(M, cap)


# ----------------------------------------------------------------------------
# Pallas kernels
# ----------------------------------------------------------------------------
def _mm_kernel(x_ref, w_ref, s_ref, b_ref, o_ref, *, relu):
    y = jnp.dot(x_ref[...], w_ref[...], preferred_element_type=jnp.float32)
    y = y * s_ref[...] + b_ref[...]
    if relu:
        y = jnp.maximum(y, 0.0)
    o_ref[...] = y.astype(o_ref.dtype)


def _mm_res_kernel(x_ref, w_ref, s_ref, b_ref, r_ref, o_ref, *, relu):
    y = jnp.dot(x_ref[...], w_ref[...], preferred_element_type=jnp.float32)
    y = y * s_ref[...] + b_ref[...] + r_ref[...].astype(jnp.float32)
    if relu:
        y = jnp.maximum(y, 0.0)
    o_ref[...] = y.astype(o_ref.dtype)


def _fc_kernel(x_ref, w_ref, b_ref, o_ref, acc_ref):
    @pl.when(pl.program_id(0) == 0)
    def _init():
        acc_ref[...] = jnp.zeros_like(acc_ref)

    acc_ref[...] += jnp.dot(x_ref[...], w_ref[...],
                            preferred_element_type=jnp.float32)

    @pl.when(pl.program_id(0) == pl.num_programs(0) - 1)
    def _fin():
        o_ref[...] = acc_ref[...] + b_ref[...]


def _maxpool_reduce_kernel(x_ref, o_ref):
    o_ref[...] = jnp.max(x_ref[...], axis=0)


def _avgpool_kernel(x_ref, o_ref, *, kh, kw, oh, ow):
    acc = jnp.zeros(o_ref.shape[1:], jnp.float32)
    for dy in range(kh):
        for dx in range(kw):
            acc = acc + x_ref[0, dy:dy + oh, dx:dx + ow, :].astype(jnp.float32)
    o_ref[0] = (acc * (1.0 / (kh * kw))).astype(o_ref.dtype)


# ----------------------------------------------------------------------------
# Matmul wrappers (conv + folded BN [+ residual] [+ ReLU] epilogue)
# ----------------------------------------------------------------------------
@functools.partial(jax.jit, static_argnames=("relu", "out_dtype"))
def matmul_bn_act(x, w, scale, shift, residual=None, *, relu,
                  out_dtype=jnp.bfloat16):
    """out = maybe_relu((x @ w) * scale + shift [+ residual]).

    x: [M, K] bf16, w: [Kp, N] bf16 (K pre-padded to 128 multiples at prep time
    when needed), scale/shift: [1, N] f32, residual: optional [M, N].
    Full-K single matmul step per (M, N) tile.
    """
    M, K = x.shape
    Kw, N = w.shape
    tm, Mp = _pick_tm(M)
    tn = N if N <= 256 else 256
    pad_m, pad_k = Mp - M, Kw - K
    if pad_m or pad_k:
        x = jnp.pad(x, ((0, pad_m), (0, pad_k)))
        if residual is not None and pad_m:
            residual = jnp.pad(residual, ((0, pad_m), (0, 0)))

    in_specs = [
        pl.BlockSpec((tm, Kw), lambda i, j: (i, 0)),
        pl.BlockSpec((Kw, tn), lambda i, j: (0, j)),
        pl.BlockSpec((1, tn), lambda i, j: (0, j)),
        pl.BlockSpec((1, tn), lambda i, j: (0, j)),
    ]
    args = [x, w, scale, shift]
    if residual is not None:
        in_specs.append(pl.BlockSpec((tm, tn), lambda i, j: (i, j)))
        args.append(residual)
        kernel = functools.partial(_mm_res_kernel, relu=relu)
    else:
        kernel = functools.partial(_mm_kernel, relu=relu)

    out = pl.pallas_call(
        kernel,
        out_shape=jax.ShapeDtypeStruct((Mp, N), out_dtype),
        grid=(Mp // tm, N // tn),
        in_specs=in_specs,
        out_specs=pl.BlockSpec((tm, tn), lambda i, j: (i, j)),
        compiler_params=pltpu.CompilerParams(
            dimension_semantics=("parallel", "parallel")),
    )(*args)
    return out[:M] if Mp != M else out


@functools.partial(jax.jit, static_argnames=("ct", "relu", "out_dtype"))
def grouped_matmul_bn_act(x, w, scale, shift, *, ct, relu,
                          out_dtype=jnp.bfloat16):
    """Group-aware grouped-conv matmul.

    x: [M, ct*Kg] patches laid out (cluster, tap, 128-channel) along K,
    w: [ct*Kg, 128] compacted per-cluster block-diagonal weight.
    Output tile j only contracts the Kg = kh*kw*128 columns of its cluster.
    """
    M, _ = x.shape
    Kg = w.shape[0] // ct
    N = ct * LANE
    tm, Mp = _pick_tm(M)
    if Mp != M:
        x = jnp.pad(x, ((0, Mp - M), (0, 0)))

    out = pl.pallas_call(
        functools.partial(_mm_kernel, relu=relu),
        out_shape=jax.ShapeDtypeStruct((Mp, N), out_dtype),
        grid=(Mp // tm, ct),
        in_specs=[
            pl.BlockSpec((tm, Kg), lambda i, j: (i, j)),
            pl.BlockSpec((Kg, LANE), lambda i, j: (j, 0)),
            pl.BlockSpec((1, LANE), lambda i, j: (0, j)),
            pl.BlockSpec((1, LANE), lambda i, j: (0, j)),
        ],
        out_specs=pl.BlockSpec((tm, LANE), lambda i, j: (i, j)),
        compiler_params=pltpu.CompilerParams(
            dimension_semantics=("parallel", "parallel")),
    )(x, w, scale, shift)
    return out[:M] if Mp != M else out


@jax.jit
def fc_matmul(x, w, b):
    """Classifier: [1, K] @ [K, N] + b with a coarse K-tiled accumulator."""
    M, K = x.shape
    N = w.shape[1]
    tk = min(8192, K)
    return pl.pallas_call(
        _fc_kernel,
        out_shape=jax.ShapeDtypeStruct((M, N), jnp.float32),
        grid=(K // tk,),
        in_specs=[
            pl.BlockSpec((M, tk), lambda k: (0, k)),
            pl.BlockSpec((tk, N), lambda k: (k, 0)),
            pl.BlockSpec((1, N), lambda k: (0, 0)),
        ],
        out_specs=pl.BlockSpec((M, N), lambda k: (0, 0)),
        scratch_shapes=[pltpu.VMEM((M, N), jnp.float32)],
        compiler_params=pltpu.CompilerParams(
            dimension_semantics=("arbitrary",)),
    )(x, w, b)


# ----------------------------------------------------------------------------
# Convolution glue (activation side; weights are pre-transformed once)
# ----------------------------------------------------------------------------
def im2col(x, kh, kw, stride, padding):
    """[N,H,W,C] -> ([N*OH*OW, kh*kw*C] tap-major channel-minor, OH, OW)."""
    N, H, W, C = x.shape
    xp = jnp.pad(x, ((0, 0), (padding, padding), (padding, padding), (0, 0)))
    OH = (H + 2 * padding - kh) // stride + 1
    OW = (W + 2 * padding - kw) // stride + 1
    taps = []
    for dy in range(kh):
        for dx in range(kw):
            taps.append(jax.lax.slice(
                xp,
                (0, dy, dx, 0),
                (N, dy + (OH - 1) * stride + 1, dx + (OW - 1) * stride + 1, C),
                (1, stride, stride, 1)))
    patches = jnp.concatenate(taps, axis=-1)
    return patches.reshape(N * OH * OW, kh * kw * C), OH, OW


@functools.partial(jax.jit, static_argnames=("k", "stride", "padding", "relu"))
def conv_dense(x, wmat, scale, shift, *, k, stride, padding, relu):
    """Dense kxk conv (only conv1 uses this path)."""
    patches, OH, OW = im2col(x, k, k, stride, padding)
    out = matmul_bn_act(patches, wmat, scale, shift, relu=relu)
    return out.reshape(x.shape[0], OH, OW, -1)


@functools.partial(jax.jit, static_argnames=("stride", "relu"))
def conv1x1(x, wmat, scale, shift, residual=None, *, stride, relu):
    """1x1 conv + BN [+ residual] [+ ReLU]."""
    N, H, W, C = x.shape
    if stride > 1:
        x = x[:, ::stride, ::stride, :]
        H, W = x.shape[1], x.shape[2]
    xm = x.reshape(N * H * W, C)
    res = None if residual is None else residual.reshape(N * H * W, -1)
    out = matmul_bn_act(xm, wmat, scale, shift, res, relu=relu)
    return out.reshape(N, H, W, -1)


@functools.partial(jax.jit, static_argnames=("ct", "relu"))
def conv_grouped3x3(x, wmat, scale, shift, *, ct, relu):
    """Grouped 3x3 / s1 / p1 conv; patches laid out (cluster, tap, 128)."""
    N, H, W, C = x.shape
    cpc = C // ct                              # channels per cluster (= 128)
    xp = jnp.pad(x, ((0, 0), (1, 1), (1, 1), (0, 0)))
    taps = []
    for dy in range(3):
        for dx in range(3):
            t = jax.lax.slice(xp, (0, dy, dx, 0), (N, dy + H, dx + W, C))
            taps.append(t.reshape(N, H, W, ct, cpc))
    patches = jnp.stack(taps, axis=4).reshape(N * H * W, ct * 9 * cpc)
    # TODO(synk): im2col is still materialized in HBM (fused shifted-window
    # reads via an Element-offset LHS index_map not implemented).
    out = grouped_matmul_bn_act(patches, wmat, scale, shift, ct=ct, relu=relu)
    return out.reshape(N, H, W, C)


# ----------------------------------------------------------------------------
# Pooling
# ----------------------------------------------------------------------------
@jax.jit
def maxpool3x3s2(x):
    # TODO(synk): taps are still gathered/stacked in HBM before the reduction.
    N, H, W, C = x.shape
    OH, OW = (H - 3) // 2 + 1, (W - 3) // 2 + 1
    taps = []
    for dy in range(3):
        for dx in range(3):
            taps.append(jax.lax.slice(
                x, (0, dy, dx, 0),
                (N, dy + (OH - 1) * 2 + 1, dx + (OW - 1) * 2 + 1, C),
                (1, 2, 2, 1)))
    M = N * OH * OW
    stacked = jnp.stack(taps, axis=0).reshape(9, M, C)
    tm, Mp = _pick_tm(M)
    if Mp != M:
        stacked = jnp.pad(stacked, ((0, 0), (0, Mp - M), (0, 0)))
    out = pl.pallas_call(
        _maxpool_reduce_kernel,
        out_shape=jax.ShapeDtypeStruct((Mp, C), x.dtype),
        grid=(Mp // tm,),
        in_specs=[pl.BlockSpec((9, tm, C), lambda i: (0, i, 0))],
        out_specs=pl.BlockSpec((tm, C), lambda i: (i, 0)),
        compiler_params=pltpu.CompilerParams(
            dimension_semantics=("parallel",)),
    )(stacked)
    return out[:M].reshape(N, OH, OW, C)


@jax.jit
def avgpool7x7(x):
    """7x7 / s1 average pool done as an in-kernel windowed reduction."""
    N, H, W, C = x.shape
    OH, OW = H - 6, W - 6
    tc = min(256, C)
    return pl.pallas_call(
        functools.partial(_avgpool_kernel, kh=7, kw=7, oh=OH, ow=OW),
        out_shape=jax.ShapeDtypeStruct((N, OH, OW, C), x.dtype),
        grid=(N, C // tc),
        in_specs=[pl.BlockSpec((1, H, W, tc), lambda n, j: (n, 0, 0, j))],
        out_specs=pl.BlockSpec((1, OH, OW, tc), lambda n, j: (n, 0, 0, j)),
        compiler_params=pltpu.CompilerParams(
            dimension_semantics=("parallel", "parallel")),
    )(x)


# ----------------------------------------------------------------------------
# Parameters: synthetic raw weights (PyTorch shapes) + one-time preparation
# ----------------------------------------------------------------------------
class KeyGen:
    def __init__(self, key):
        self.key = key

    def next(self):
        self.key, k = jax.random.split(self.key)
        return k


def conv_bn_params(kg, cin, cout, k, groups=1):
    fan_in = (cin // groups) * k * k
    w = jax.random.normal(kg.next(), (cout, cin // groups, k, k),
                          jnp.float32) * np.sqrt(2.0 / fan_in)
    b = jax.random.normal(kg.next(), (cout,), jnp.float32) * 0.01
    gamma = jax.random.uniform(kg.next(), (cout,), jnp.float32, 0.7, 0.9)
    beta = jax.random.normal(kg.next(), (cout,), jnp.float32) * 0.01
    mean = jax.random.normal(kg.next(), (cout,), jnp.float32) * 0.01
    var = jax.random.uniform(kg.next(), (cout,), jnp.float32, 0.9, 1.1)
    return dict(w=w, b=b, gamma=gamma, beta=beta, mean=mean, var=var)


def bottleneck_params(kg, in_dim, mid_dim, out_dim, down, starting=False):
    if starting:
        down = False
    width = mid_dim // 64 * 32 * 4
    k = 2 if down else 1
    return dict(
        k=k,
        c1=conv_bn_params(kg, in_dim, width, 1),
        c2=conv_bn_params(kg, width, width, 3, groups=GROUPS),
        c3=conv_bn_params(kg, width, out_dim, 1),
        changedim=conv_bn_params(kg, in_dim, out_dim, 1),
    )


def make_layer_params(kg, in_dim, mid_dim, out_dim, repeats, starting=False):
    layers = [bottleneck_params(kg, in_dim, mid_dim, out_dim, down=True,
                                starting=starting)]
    for _ in range(1, repeats):
        layers.append(bottleneck_params(kg, out_dim, mid_dim, out_dim,
                                        down=False))
    return layers


def resnext_params(key, repeats=(3, 4, 6, 3), num_classes=NUM_CLASSES):
    kg = KeyGen(key)
    base = 64
    p = {}
    p["conv1"] = conv_bn_params(kg, 3, 64, 7)
    p["conv2"] = make_layer_params(kg, base, base, base * 4, repeats[0],
                                   starting=True)
    p["conv3"] = make_layer_params(kg, base * 4, base * 2, base * 8, repeats[1])
    p["conv4"] = make_layer_params(kg, base * 8, base * 4, base * 16, repeats[2])
    p["conv5"] = make_layer_params(kg, base * 16, base * 8, base * 32, repeats[3])
    fin = 2048 * 8 * 8
    p["fc_w"] = jax.random.normal(kg.next(), (num_classes, fin),
                                  jnp.float32) / np.sqrt(fin)
    p["fc_b"] = jax.random.normal(kg.next(), (num_classes,), jnp.float32) * 0.01
    return p


def _fold_bn(p):
    scale = (p["gamma"] / jnp.sqrt(p["var"] + BN_EPS)).astype(jnp.float32)
    shift = ((p["b"] - p["mean"]) * scale + p["beta"]).astype(jnp.float32)
    return scale, shift


def prep_conv(p):
    """Dense conv: [K, N] bf16 weight (K padded to x128) + folded BN."""
    w = p["w"]
    cout, cin, kh, kw = w.shape
    scale, shift = _fold_bn(p)
    if kh == 1 and kw == 1:
        wmat = w.reshape(cout, cin).T
    else:
        wmat = jnp.transpose(w, (2, 3, 1, 0)).reshape(kh * kw * cin, cout)
    K = wmat.shape[0]
    Kp = _round_up(K, LANE)
    if Kp != K:
        wmat = jnp.pad(wmat, ((0, Kp - K), (0, 0)))
    return {"wmat": wmat.astype(jnp.bfloat16),
            "scale": scale.reshape(1, cout),
            "shift": shift.reshape(1, cout)}


def prep_conv_grouped(p, groups=GROUPS):
    """Grouped 3x3 conv -> per-128-channel-cluster compacted weight blocks."""
    w = p["w"]                          # [cout, cg, 3, 3]
    cout, cg, kh, kw = w.shape
    ct = cout // LANE                   # channel clusters of 128
    gpt = LANE // cg                    # groups per cluster
    scale, shift = _fold_bn(p)
    w_r = w.reshape(ct, gpt, cg, cg, kh, kw)          # [j, g, co, ci, ky, kx]
    blocks = jnp.transpose(w_r, (0, 4, 5, 1, 3, 2))   # [j, ky, kx, g, ci, co]
    eye = jnp.eye(gpt, dtype=w.dtype)
    dense = jnp.einsum('jyxgic,gh->jyxgihc', blocks, eye)
    wmat = dense.reshape(ct * kh * kw * LANE, LANE)   # [ct*1152, 128]
    return {"wmat": wmat.astype(jnp.bfloat16),
            "scale": scale.reshape(1, cout),
            "shift": shift.reshape(1, cout),
            "ct": ct}


def prepare_params(raw, num_classes=NUM_CLASSES):
    pp = {"conv1": prep_conv(raw["conv1"])}
    for stage in ("conv2", "conv3", "conv4", "conv5"):
        blocks = []
        for b in raw[stage]:
            blocks.append({
                "k": b["k"],
                "changedim": prep_conv(b["changedim"]),
                "c1": prep_conv(b["c1"]),
                "c2": prep_conv_grouped(b["c2"]),
                "c3": prep_conv(b["c3"]),
            })
        pp[stage] = blocks
    # torch flattens NCHW -> (C, H, W); permute the FC weight once so it
    # matches our NHWC (H, W, C) flatten order (mathematically identical).
    ncls = raw["fc_w"].shape[0]
    w2 = raw["fc_w"].reshape(ncls, 2048, 8, 8)
    w2 = jnp.transpose(w2, (2, 3, 1, 0)).reshape(8 * 8 * 2048, ncls)
    pp["fc_w"] = w2.astype(jnp.bfloat16)
    pp["fc_b"] = raw["fc_b"].reshape(1, ncls).astype(jnp.float32)
    return pp


# ----------------------------------------------------------------------------
# Forward pass
# ----------------------------------------------------------------------------
def bottleneck_forward(x, p):
    cd, c1, c2, c3 = p["changedim"], p["c1"], p["c2"], p["c3"]
    identity = conv1x1(x, cd["wmat"], cd["scale"], cd["shift"],
                       stride=p["k"], relu=False)
    h = conv1x1(x, c1["wmat"], c1["scale"], c1["shift"],
                stride=p["k"], relu=True)
    h = conv_grouped3x3(h, c2["wmat"], c2["scale"], c2["shift"],
                        ct=c2["ct"], relu=True)
    # residual add + ReLU fused into the c3 matmul epilogue
    h = conv1x1(h, c3["wmat"], c3["scale"], c3["shift"], residual=identity,
                stride=1, relu=True)
    return h


def resnext_forward(pp, x_nchw):
    x = jnp.transpose(x_nchw, (0, 2, 3, 1)).astype(jnp.bfloat16)  # NCHW->NHWC
    c1 = pp["conv1"]
    x = conv_dense(x, c1["wmat"], c1["scale"], c1["shift"],
                   k=7, stride=2, padding=4, relu=True)
    x = maxpool3x3s2(x)
    for stage in ("conv2", "conv3", "conv4", "conv5"):
        for blk in pp[stage]:
            x = bottleneck_forward(x, blk)
    x = avgpool7x7(x)                                  # [N, 8, 8, 2048]
    xf = x.reshape(x.shape[0], -1)                     # NHWC flatten
    return fc_matmul(xf, pp["fc_w"], pp["fc_b"])


if __name__ == "__main__":
    key = jax.random.PRNGKey(0)
    pkey, xkey = jax.random.split(key)
    raw = resnext_params(pkey, repeats=(3, 4, 6, 3), num_classes=NUM_CLASSES)
    params = prepare_params(raw, num_classes=NUM_CLASSES)
    # Spatial size 448 is implied by the module's hard-coded Linear(2048*8*8,...)
    # classifier (avgpool output must be 8x8); batch kept at 1 to stay small.
    x = jax.random.normal(xkey, (1, 3, 448, 448), jnp.float32)
    logits = jax.block_until_ready(resnext_forward(params, x))
    assert logits.shape == (1, NUM_CLASSES), logits.shape
    assert bool(jnp.all(jnp.isfinite(logits)))
    print("KERNEL_OK")
</pallas_src>

<mosaic_0001>
module attributes {stable_mosaic.version = 11 : i64} {
  func.func @_mm_kernel(%arg0: i32, %arg1: i32, %arg2: memref<512x256xbf16, #tpu.memory_space<vmem>>, %arg3: memref<256x64xbf16, #tpu.memory_space<vmem>>, %arg4: memref<1x64xf32, #tpu.memory_space<vmem>>, %arg5: memref<1x64xf32, #tpu.memory_space<vmem>>, %arg6: memref<512x64xbf16, #tpu.memory_space<vmem>>) attributes {dimension_semantics = [#tpu.dimension_semantics<parallel>, #tpu.dimension_semantics<parallel>], iteration_bounds = array<i64: 99, 1>, scalar_prefetch = 0 : i64, scratch_operands = 0 : i64, tpu.core_type = #tpu.core_type<tc>, window_params = [{transform_indices = @transform_0, window_bounds = array<i64: 512, 256>}, {transform_indices = @transform_1, window_bounds = array<i64: 256, 64>}, {transform_indices = @transform_2, window_bounds = array<i64: 1, 64>}, {transform_indices = @transform_3, window_bounds = array<i64: 1, 64>}, {transform_indices = @transform_4, window_bounds = array<i64: 512, 64>}]} {
    %c0 = arith.constant 0 : index
    %c0_0 = arith.constant 0 : index
    %0 = vector.load %arg2[%c0, %c0_0] : memref<512x256xbf16, #tpu.memory_space<vmem>>, vector<512x256xbf16>
    %c0_1 = arith.constant 0 : index
    %c0_2 = arith.constant 0 : index
    %1 = vector.load %arg3[%c0_1, %c0_2] : memref<256x64xbf16, #tpu.memory_space<vmem>>, vector<256x64xbf16>
    %cst = arith.constant dense<0.000000e+00> : vector<512x64xf32>
    %2 = tpu.matmul %0, %1, %cst {dimension_numbers = #tpu.dot_dimension_numbers<[1], [0], [0], [1], [0, 0, 1, 1], [], []>} : vector<512x256xbf16>, vector<256x64xbf16>, vector<512x64xf32> -> vector<512x64xf32>
    %c0_3 = arith.constant 0 : index
    %c0_4 = arith.constant 0 : index
    %3 = vector.load %arg4[%c0_3, %c0_4] : memref<1x64xf32, #tpu.memory_space<vmem>>, vector<1x64xf32>
    %4 = vector.broadcast %3 : vector<1x64xf32> to vector<512x64xf32>
    %5 = arith.mulf %2, %4 : vector<512x64xf32>
    %c0_5 = arith.constant 0 : index
    %c0_6 = arith.constant 0 : index
    %6 = vector.load %arg5[%c0_5, %c0_6] : memref<1x64xf32, #tpu.memory_space<vmem>>, vector<1x64xf32>
    %7 = vector.broadcast %6 : vector<1x64xf32> to vector<512x64xf32>
    %8 = arith.addf %5, %7 : vector<512x64xf32>
    %cst_7 = arith.constant 0.000000e+00 : f32
    %9 = vector.broadcast %cst_7 : f32 to vector<512x64xf32>
    %10 = arith.maximumf %8, %9 : vector<512x64xf32>
    %11 = arith.truncf %10 : vector<512x64xf32> to vector<512x64xbf16>
    %c0_8 = arith.constant 0 : index
    %c0_9 = arith.constant 0 : index
    %12 = vector.load %arg6[%c0_8, %c0_9] : memref<512x64xbf16, #tpu.memory_space<vmem>>, vector<512x64xbf16>
    tpu.vector_store %arg6[%c0_8, %c0_9], %11 {strides = array<i32>} : memref<512x64xbf16, #tpu.memory_space<vmem>>, vector<512x64xbf16>,
    return
  }
  func.func @transform_0(%arg0: i32, %arg1: i32) -> (i32, i32) {
    %c0_i32 = arith.constant 0 : i32
    %c0_i32_0 = arith.constant 0 : i32
    return %arg0, %c0_i32 : i32, i32
  }
  func.func @transform_1(%arg0: i32, %arg1: i32) -> (i32, i32) {
    %c0_i32 = arith.constant 0 : i32
    %c0_i32_0 = arith.constant 0 : i32
    return %c0_i32, %arg1 : i32, i32
  }
  func.func @transform_2(%arg0: i32, %arg1: i32) -> (i32, i32) {
    %c0_i32 = arith.constant 0 : i32
    %c0_i32_0 = arith.constant 0 : i32
    return %c0_i32, %arg1 : i32, i32
  }
  func.func @transform_3(%arg0: i32, %arg1: i32) -> (i32, i32) {
    %c0_i32 = arith.constant 0 : i32
    %c0_i32_0 = arith.constant 0 : i32
    return %c0_i32, %arg1 : i32, i32
  }
  func.func @transform_4(%arg0: i32, %arg1: i32) -> (i32, i32) {
    %c0_i32 = arith.constant 0 : i32
    return %arg0, %arg1 : i32, i32
  }
}

</mosaic_0001>

<bundles_post_ra>
// kernel: matmul_bn_act.1
= control target key start
LH: loop header
LB: loop body
LE: loop exit
PB: predicated region body
PF: predicated region fallthrough
CT: control target
= control target key end

     0   :  { %9 = vsyncpa [#allocation3], 0  ;;  %s2789_s0 = inlined_call_operand.vmem [shape: bf16[50688,256], index: 0, kind: input, shape index: {}]   ;;  %s2790_s1 = inlined_call_operand.vmem [shape: bf16[256,64], index: 1, kind: input, shape index: {}]   ;;  %s2791_s2 = inlined_call_operand.vmem [shape: f32[1,64], index: 2, kind: input, shape index: {}]   ;;  %s2792_s3 = inlined_call_operand.vmem [shape: f32[1,64], index: 3, kind: input, shape index: {}]   ;;  %s2793_s4 = inlined_call_operand.hbm [shape: bf16[50688,64], index: 4, kind: output, shape index: {}]  }
   0x1   :  { %11 = vsyncpa [#allocation3 + $0x1], 0  ;;  %s2256_s15 = smov 0   ;;  %s2258_s16 = smov 0  }
   0x2   :  { %s2260_s17 = smov 0   ;;  %s2262_s18 = smov 0  }
   0x3   :  { %s2264_s19 = smov 0   ;;  %s2266_s20 = smov 0  }
   0x4 LB: > { %s1716_s21 = sadd.s32 4294967295, %s2225_s20   ;;  %s1717_s22 = sadd.s32 4294967294, %s2225_s20   ;;  %s2225_s20 = sphi %s2266_s20, %s17_s20   ;;  %s2221_s19 = sphi %s2264_s19, %s2800_s19   ;;  %s2217_s18 = sphi %s2262_s18, %s2799_s18   ;;  %s2213_s17 = sphi %s2260_s17, %s2798_s17   ;;  %s2209_s16 = sphi %s2258_s16, %s2797_s16   ;;  %s2205_s15 = sphi %s2256_s15, %s2796_s15  }
   0x5   : > { %s29_s23 = sadd.s32 1, %s2221_s19  ;;  %s142_s24 = sadd.s32 1, %s2213_s17 }
   0x6   : > { %p31_p0 = scmp.ge.s32.totalorder %s29_s23, 99  ;;  %p152_p1 = scmp.ne.s32.totalorder %s2213_s17, %s2209_s16 }
   0x7   : > { %p153_p2 = scmp.eq.s32.totalorder %s1716_s21, 98  ;;  %p158_p3 = scmp.ne.s32.totalorder %s2209_s16, %s2205_s15 }
   0x8   : > { %s2802_s23 = smov (%p31_p0, %s29_s23), 0  ;;  %p159_p5 = scmp.eq.s32.totalorder %s1717_s22, 98 }
   0x9   : > { %p2296_p4 = por %p153_p2, %p152_p1  ;;  %s137_s26 = ssub.s32 %s2221_s19, %s2802_s23 }
   0xa   : > { %p1723_p6 = scmp.ge.s32.totalorder %s2225_s20, 1  ;;  %p140_p7 = scmp.eq.s32.totalorder %s137_s26, 0 }
   0xb   : > { %p2303_p8 = por %p159_p5, %p158_p3  ;;  %p206_p9 = scmp.lt.s32.totalorder %s2225_s20, 100 }
   0xc   : > { %s2309_s28 = scalar_select %p140_p7, %s2213_s17, %s142_s24  }
   0xd   : > { %p207_p10 = pnand %p1723_p6, %p206_p9 }
   0xe   : > { %v2035_v0 = vld [vmem:[%s2790_s1] sm:$0xff] (!%p207_p10)   ;;  %v2227_v1 = vmov (!%p207_p10), 0   ;;  %s1725_s5 = sshll.u32 (!%p207_p10), %s2217_s18, 6  ;;  %v2036_v2 = vld [vmem:[%s2790_s1 + $0x8] sm:$0xff] (!%p207_p10)   ;;  %v2037_v3 = vld [vmem:[%s2790_s1 + $0x10] sm:$0xff] (!%p207_p10)   ;;  %s240_s11 = sand.u32 (!%p207_p10), 1, %s2209_s16  }
   0xf   : > { %210 = sbr.rel (%p207_p10) target bundleno = 436 (0x1b4), region = 36  ;;  %774 = vmatprep.subr.bf16.mxu0 (!%p207_p10), %v2227_v1  ;;  %1945 = vmatprep.subr.bf16.mxu1 (!%p207_p10), %v2227_v1  ;;  %p244_p11 = scmp.lt.s32.totalorder (!%p207_p10), %s1725_s5, 6335  ;;  %v2038_v4 = vld [vmem:[%s2790_s1 + $0x18] sm:$0xff] (!%p207_p10)   ;;  %v2039_v5 = vld [vmem:[%s2790_s1 + $0x20] sm:$0xff] (!%p207_p10)   ;;  %v2040_v7 = vld [vmem:[%s2790_s1 + $0x28] sm:$0xff] (!%p207_p10)   ;;  %vm1525_vm0 = vcmask (!%p207_p10), 519168  }
  0x10   : > { %775 = vmatpush1.bf16.msra.mxu0 (!%p207_p10), %v2035_v0  ;;  %1961 = vmatpush1.bf16.msra.mxu1 (!%p207_p10), %v2035_v0  ;;  %v2041_v9 = vld [vmem:[%s2790_s1 + $0x30] sm:$0xff] (!%p207_p10)   ;;  %v2042_v10 = vld [vmem:[%s2790_s1 + $0x38] sm:$0xff] (!%p207_p10)   ;;  %v2043_v11 = vld [vmem:[%s2790_s1 + $0x40] sm:$0xff] (!%p207_p10)   ;;  %s1944_s21 = sshll.u32 (!%p207_p10), %s2217_s18, 12  ;;  %s2743_s18 = scalar_lea.sflag (!%p207_p10), [#allocation3], %s240_s11 }
  0x11   : > { %776 = vmatprep.subr.bf16.mxu0 (!%p207_p10), %v2227_v1  ;;  %1946 = vmatprep.subr.bf16.mxu1 (!%p207_p10), %v2227_v1  ;;  %v2044_v12 = vld [vmem:[%s2790_s1 + $0x48] sm:$0xff] (!%p207_p10)   ;;  %v2045_v13 = vld [vmem:[%s2790_s1 + $0x50] sm:$0xff] (!%p207_p10)   ;;  %v2046_v14 = vld [vmem:[%s2790_s1 + $0x58] sm:$0xff] (!%p207_p10)   ;;  %s2729_s30 = scalar_lea.hbm (!%p207_p10), %s2793_s4, %s1944_s21  ;;  %s2228_s6 = smov (!%p207_p10), [#allocation2]  }
  0x12   : > { %v2047_v15 = vld [vmem:[%s2790_s1 + $0x60] sm:$0xff] (!%p207_p10)   ;;  %v2048_v16 = vld [vmem:[%s2790_s1 + $0x68] sm:$0xff] (!%p207_p10)   ;;  %v2049_v17 = vld [vmem:[%s2790_s1 + $0x70] sm:$0xff] (!%p207_p10)   ;;  %s2151_s7 = sshll.u32 (!%p207_p10), %s2228_s6, 4  ;;  %s2152_s7 = int_to_ptr.vmem [resolvable:$false] %s2151_s7 }
  0x13   : > { %v2050_v18 = vld [vmem:[%s2790_s1 + $0x78] sm:$0xff] (!%p207_p10)   ;;  %s2153_s8 = scalar_lea.vmem (!%p207_p10), %s2152_s7, 8192 }
  0x14   : > { %777 = vmatpush1.bf16.msra.mxu0 (!%p207_p10), %v2036_v2  ;;  %1962 = vmatpush1.bf16.msra.mxu1 (!%p207_p10), %v2036_v2 }
  0x15   : > { %778 = vmatprep.subr.bf16.mxu0 (!%p207_p10), %v2227_v1  ;;  %1947 = vmatprep.subr.bf16.mxu1 (!%p207_p10), %v2227_v1 }
  0x16   : > { %s2804_s5 = smov (!%p244_p11, %s1725_s5), 6335 }
  0x17   : > { %s1879_s12 = sshll.u32 %s2804_s5, 3 }
  0x18   : > { %779 = vmatpush1.bf16.msra.mxu0 %v2037_v3  ;;  %1963 = vmatpush1.bf16.msra.mxu1 %v2037_v3  ;;  %s2338_s24 = scalar_lea.vmem %s2789_s0, %s1879_s12 }
  0x19   : > { %780 = vmatprep.subr.bf16.mxu0 %v2227_v1  ;;  %1948 = vmatprep.subr.bf16.mxu1 %v2227_v1  ;;  %v2053_v6 = vld [vmem:[%s2338_s24 + $0x4] ss:$8 sps:$4 sm:$0xff]   ;;  %v2051_v19 = vld [vmem:[%s2338_s24] ss:$8 sps:$4 sm:$0xff]   ;;  %v2057_v21 = vld [vmem:[%s2338_s24 + $0x14] ss:$8 sps:$4 sm:$0xff]  }
  0x1a   : > { %v2056_v8 = vld [vmem:[%s2338_s24 + $0x104] ss:$8 sps:$4 sm:$0xff]   ;;  %806 = vmatprep.mubr.bf16.mxu0 %v2053_v6  ;;  %v2054_v20 = vld [vmem:[%s2338_s24 + $0x100] ss:$8 sps:$4 sm:$0xff]   ;;  %v2059_v22 = vld [vmem:[%s2338_s24 + $0x114] ss:$8 sps:$4 sm:$0xff]  }
  0x1b   : > { %934 = vmatprep.mubr.bf16.mxu1 %v2056_v8  ;;  %v2061_v23 = vld [vmem:[%s2338_s24 + $0x10] ss:$8 sps:$4 sm:$0xff]   ;;  %v2063_v25 = vld [vmem:[%s2338_s24 + $0x24] ss:$8 sps:$4 sm:$0xff]   ;;  %v2067_v27 = vld [vmem:[%s2338_s24 + $0x20] ss:$8 sps:$4 sm:$0xff]  }
  0x1c   : > { %781 = vmatpush1.bf16.msra.mxu0 %v2038_v4  ;;  %1964 = vmatpush1.bf16.msra.mxu1 %v2038_v4  ;;  %v2062_v24 = vld [vmem:[%s2338_s24 + $0x110] ss:$8 sps:$4 sm:$0xff]   ;;  %v2065_v26 = vld [vmem:[%s2338_s24 + $0x124] ss:$8 sps:$4 sm:$0xff]   ;;  %v2068_v28 = vld [vmem:[%s2338_s24 + $0x120] ss:$8 sps:$4 sm:$0xff]  }
  0x1d   : > { %782 = vmatprep.subr.bf16.mxu0 %v2227_v1  ;;  %1949 = vmatprep.subr.bf16.mxu1 %v2227_v1  ;;  %v2069_v29 = vld [vmem:[%s2338_s24 + $0x34] ss:$8 sps:$4 sm:$0xff]   ;;  %v2073_v31 = vld [vmem:[%s2338_s24 + $0x30] ss:$8 sps:$4 sm:$0xff]   ;;  %v2075_v33 = vld [vmem:[%s2338_s24 + $0x44] ss:$8 sps:$4 sm:$0xff]  }
  0x1e   : > { %v2071_v30 = vld [vmem:[%s2338_s24 + $0x134] ss:$8 sps:$4 sm:$0xff]   ;;  %v2074_v32 = vld [vmem:[%s2338_s24 + $0x130] ss:$8 sps:$4 sm:$0xff]   ;;  %v2077_v34 = vld [vmem:[%s2338_s24 + $0x144] ss:$8 sps:$4 sm:$0xff]  }
  0x1f   : > { %v2079_v35 = vld [vmem:[%s2338_s24 + $0x40] ss:$8 sps:$4 sm:$0xff]   ;;  %v2081_v37 = vld [vmem:[%s2338_s24 + $0x54] ss:$8 sps:$4 sm:$0xff]   ;;  %v2085_v39 = vld [vmem:[%s2338_s24 + $0x50] ss:$8 sps:$4 sm:$0xff]  }
  0x20   : > { %783 = vmatpush1.bf16.msra.mxu0 %v2039_v5  ;;  %1965 = vmatpush1.bf16.msra.mxu1 %v2039_v5  ;;  %v2080_v36 = vld [vmem:[%s2338_s24 + $0x140] ss:$8 sps:$4 sm:$0xff]   ;;  %v2083_v38 = vld [vmem:[%s2338_s24 + $0x154] ss:$8 sps:$4 sm:$0xff]   ;;  %v2086_v40 = vld [vmem:[%s2338_s24 + $0x150] ss:$8 sps:$4 sm:$0xff]  }
  0x21   : > { %784 = vmatprep.subr.bf16.mxu0 %v2227_v1  ;;  %1950 = vmatprep.subr.bf16.mxu1 %v2227_v1  ;;  %v2087_v41 = vld [vmem:[%s2338_s24 + $0x64] ss:$8 sps:$4 sm:$0xff]   ;;  %v2091_v43 = vld [vmem:[%s2338_s24 + $0x60] ss:$8 sps:$4 sm:$0xff]   ;;  %v2093_v45 = vld [vmem:[%s2338_s24 + $0x74] ss:$8 sps:$4 sm:$0xff]  }
  0x22   : > { %v2089_v42 = vld [vmem:[%s2338_s24 + $0x164] ss:$8 sps:$4 sm:$0xff]   ;;  %v2092_v44 = vld [vmem:[%s2338_s24 + $0x160] ss:$8 sps:$4 sm:$0xff]   ;;  %v2095_v46 = vld [vmem:[%s2338_s24 + $0x174] ss:$8 sps:$4 sm:$0xff]  }
  0x23   : > { %v2097_v47 = vld [vmem:[%s2338_s24 + $0x70] ss:$8 sps:$4 sm:$0xff]   ;;  %v2099_v49 = vld [vmem:[%s2338_s24 + $0x84] ss:$8 sps:$4 sm:$0xff]   ;;  %v2103_v51 = vld [vmem:[%s2338_s24 + $0x80] ss:$8 sps:$4 sm:$0xff]  }
  0x24   : > { %785 = vmatpush1.bf16.msra.mxu0 %v2040_v7  ;;  %1966 = vmatpush1.bf16.msra.mxu1 %v2040_v7  ;;  %v2098_v48 = vld [vmem:[%s2338_s24 + $0x170] ss:$8 sps:$4 sm:$0xff]   ;;  %v2101_v50 = vld [vmem:[%s2338_s24 + $0x184] ss:$8 sps:$4 sm:$0xff]   ;;  %v2104_v52 = vld [vmem:[%s2338_s24 + $0x180] ss:$8 sps:$4 sm:$0xff]  }
  0x25   : > { %786 = vmatprep.subr.bf16.mxu0 %v2227_v1  ;;  %1951 = vmatprep.subr.bf16.mxu1 %v2227_v1  ;;  %v2105_v53 = vld [vmem:[%s2338_s24 + $0x94] ss:$8 sps:$4 sm:$0xff]   ;;  %v2109_v55 = vld [vmem:[%s2338_s24 + $0x90] ss:$8 sps:$4 sm:$0xff]   ;;  %v2111_v57 = vld [vmem:[%s2338_s24 + $0xa4] ss:$8 sps:$4 sm:$0xff]  }
  0x26   : > { %v2107_v54 = vld [vmem:[%s2338_s24 + $0x194] ss:$8 sps:$4 sm:$0xff]   ;;  %v2110_v56 = vld [vmem:[%s2338_s24 + $0x190] ss:$8 sps:$4 sm:$0xff]   ;;  %v2113_v58 = vld [vmem:[%s2338_s24 + $0x1a4] ss:$8 sps:$4 sm:$0xff]  }
  0x27   : > { %v2115_v59 = vld [vmem:[%s2338_s24 + $0xa0] ss:$8 sps:$4 sm:$0xff]   ;;  %v2117_v61 = vld [vmem:[%s2338_s24 + $0xb4] ss:$8 sps:$4 sm:$0xff]   ;;  %v2121_v63 = vld [vmem:[%s2338_s24 + $0xb0] ss:$8 sps:$4 sm:$0xff]  }
  0x28   : > { %787 = vmatpush1.bf16.msra.mxu0 %v2041_v9  ;;  %1967 = vmatpush1.bf16.msra.mxu1 %v2041_v9  ;;  %v2116_v60 = vld [vmem:[%s2338_s24 + $0x1a0] ss:$8 sps:$4 sm:$0xff]   ;;  %v2119_v62 = vld [vmem:[%s2338_s24 + $0x1b4] ss:$8 sps:$4 sm:$0xff]   ;;  %v2122_v0 = vld [vmem:[%s2338_s24 + $0x1b0] ss:$8 sps:$4 sm:$0xff]  }
  0x29   : > { %788 = vmatprep.subr.bf16.mxu0 %v2227_v1  ;;  %1952 = vmatprep.subr.bf16.mxu1 %v2227_v1  ;;  %v2125_v2 = vld [vmem:[%s2338_s24 + $0x1c4] ss:$8 sps:$4 sm:$0xff]   ;;  %v2127_v3 = vld [vmem:[%s2338_s24 + $0xc0] ss:$8 sps:$4 sm:$0xff]   ;;  %v2129_v5 = vld [vmem:[%s2338_s24 + $0xd4] ss:$8 sps:$4 sm:$0xff]  }
  0x2a   : > { %v2128_v4 = vld [vmem:[%s2338_s24 + $0x1c0] ss:$8 sps:$4 sm:$0xff]   ;;  %v2131_v6 = vld [vmem:[%s2338_s24 + $0x1d4] ss:$8 sps:$4 sm:$0xff]   ;;  %v2133_v7 = vld [vmem:[%s2338_s24 + $0xd0] ss:$8 sps:$4 sm:$0xff]  }
  0x2b   : > { %v2134_v8 = vld [vmem:[%s2338_s24 + $0x1d0] ss:$8 sps:$4 sm:$0xff]   ;;  %v2135_v9 = vld [vmem:[%s2338_s24 + $0xe4] ss:$8 sps:$4 sm:$0xff]  }
  0x2c   : > { %789 = vmatpush1.bf16.msra.mxu0 %v2042_v10  ;;  %1968 = vmatpush1.bf16.msra.mxu1 %v2042_v10  ;;  %v2137_v10 = vld [vmem:[%s2338_s24 + $0x1e4] ss:$8 sps:$4 sm:$0xff]  }
  0x2d   : > { %790 = vmatprep.subr.bf16.mxu0 %v2227_v1  ;;  %1953 = vmatprep.subr.bf16.mxu1 %v2227_v1 }
  0x30   : > { %791 = vmatpush1.bf16.msra.mxu0 %v2043_v11  ;;  %1969 = vmatpush1.bf16.msra.mxu1 %v2043_v11  ;;  %v2139_v11 = vld [vmem:[%s2338_s24 + $0xe0] ss:$8 sps:$4 sm:$0xff]  }
  0x31   : > { %792 = vmatprep.subr.bf16.mxu0 %v2227_v1  ;;  %1954 = vmatprep.subr.bf16.mxu1 %v2227_v1 }
  0x34   : > { %793 = vmatpush1.bf16.msra.mxu0 %v2044_v12  ;;  %1970 = vmatpush1.bf16.msra.mxu1 %v2044_v12  ;;  %v2140_v12 = vld [vmem:[%s2338_s24 + $0x1e0] ss:$8 sps:$4 sm:$0xff]  }
  0x35   : > { %794 = vmatprep.subr.bf16.mxu0 %v2227_v1  ;;  %1955 = vmatprep.subr.bf16.mxu1 %v2227_v1 }
  0x38   : > { %795 = vmatpush1.bf16.msra.mxu0 %v2045_v13  ;;  %1971 = vmatpush1.bf16.msra.mxu1 %v2045_v13  ;;  %v2141_v13 = vld [vmem:[%s2338_s24 + $0xf4] ss:$8 sps:$4 sm:$0xff]  }
  0x39   : > { %796 = vmatprep.subr.bf16.mxu0 %v2227_v1  ;;  %1956 = vmatprep.subr.bf16.mxu1 %v2227_v1 }
  0x3c   : > { %797 = vmatpush1.bf16.msra.mxu0 %v2046_v14  ;;  %1972 = vmatpush1.bf16.msra.mxu1 %v2046_v14  ;;  %v2143_v14 = vld [vmem:[%s2338_s24 + $0x1f4] ss:$8 sps:$4 sm:$0xff]  }
  0x3d   : > { %798 = vmatprep.subr.bf16.mxu0 %v2227_v1  ;;  %1957 = vmatprep.subr.bf16.mxu1 %v2227_v1 }
  0x40   : > { %799 = vmatpush1.bf16.msra.mxu0 %v2047_v15  ;;  %1973 = vmatpush1.bf16.msra.mxu1 %v2047_v15  ;;  %v2145_v15 = vld [vmem:[%s2338_s24 + $0xf0] ss:$8 sps:$4 sm:$0xff]  }
  0x41   : > { %800 = vmatprep.subr.bf16.mxu0 %v2227_v1  ;;  %1958 = vmatprep.subr.bf16.mxu1 %v2227_v1 }
  0x44   : > { %801 = vmatpush1.bf16.msra.mxu0 %v2048_v16  ;;  %1974 = vmatpush1.bf16.msra.mxu1 %v2048_v16  ;;  %v2146_v16 = vld [vmem:[%s2338_s24 + $0x1f0] ss:$8 sps:$4 sm:$0xff]  }
  0x45   : > { %802 = vmatprep.subr.bf16.mxu0 %v2227_v1  ;;  %1959 = vmatprep.subr.bf16.mxu1 %v2227_v1 }
  0x48   : > { %803 = vmatpush1.bf16.msra.mxu0 %v2049_v17  ;;  %1975 = vmatpush1.bf16.msra.mxu1 %v2049_v17  ;;  %v2464_v17 = vld [vmem:[%s2791_s2] ss:$0 sm:$0xff] }
  0x49   : > { %804 = vmatprep.subr.bf16.mxu0 %v2227_v1  ;;  %1960 = vmatprep.subr.bf16.mxu1 %v2227_v1  ;;  %v2123_v1 = vld [vmem:[%s2338_s24 + $0xc4] ss:$8 sps:$4 sm:$0xff]   ;;  %s1724_s24 = sshll.u32 %s240_s11, 8 }
  0x4a   : > { %s2482_s14 = scalar_lea.vmem [#allocation2], %s1724_s24 }
  0x4b   : > { %s1605_s22 = sshll.u32 %s2482_s14, 4  ;;  %s2731_s22 = int_to_ptr.vmem [resolvable:$true] %s1605_s22 }
  0x4c   : > { %805 = vmatpush1.bf16.msra.mxu0 %v2050_v18  ;;  %1976 = vmatpush1.bf16.msra.mxu1 %v2050_v18  ;;  %s2147_s5 = scalar_lea.vmem %s2731_s22, 4096  ;;  %p2154_p1 = scmp.lt.s32.totalorder %s2731_s22, %s2152_s7 }
  0x4d   : > { %p2148_p12 = scmp.ne.s32.totalorder %s2731_s22, %s2147_s5  ;;  %p2155_p2 = scmp.lt.s32.totalorder %s2153_s8, %s2147_s5 }
  0x4f   : > { %807 = vmatmul.mubr.bf16.vlgmr.msra.gmra.mrb[0].mxu0 %v2051_v19  ;;  %935 = vmatmul.mubr.bf16.vlgmr.msra.gmra.mrb[0].mxu1 %v2054_v20  ;;  %v2470_v19 = vld [vmem:[%s2792_s3] ss:$0 sm:$0xff]  ;;  %p2149_p13 = pnand %p2148_p12, %p2296_p4  ;;  %p2156_p3 = por %p2155_p2, %p2154_p1 }
  0x50   : > { %814 = vmatprep.mubr.bf16.mxu0 %v2057_v21  ;;  %942 = vmatprep.mubr.bf16.mxu1 %v2059_v22 }
  0x51   : > { %p2150_p0 = pneg %p2149_p13 }
  0x53   : > { %p2157_p5 = pnand %p2156_p3, %p2150_p0 }
  0x57   : > { %815 = vmatmul.mubr.bf16.gmra.mrb[4].mxu0 %v2061_v23  ;;  %943 = vmatmul.mubr.bf16.gmra.mrb[4].mxu1 %v2062_v24 }
  0x58   : > { %822 = vmatprep.mubr.bf16.mxu0 %v2063_v25  ;;  %950 = vmatprep.mubr.bf16.mxu1 %v2065_v26 }
  0x5f   : > { %823 = vmatmul.mubr.bf16.gmra.mrb[8].mxu0 %v2067_v27  ;;  %951 = vmatmul.mubr.bf16.gmra.mrb[8].mxu1 %v2068_v28 }
  0x60   : > { %830 = vmatprep.mubr.bf16.mxu0 %v2069_v29  ;;  %958 = vmatprep.mubr.bf16.mxu1 %v2071_v30 }
  0x67   : > { %831 = vmatmul.mubr.bf16.gmra.mrb[12].mxu0 %v2073_v31  ;;  %959 = vmatmul.mubr.bf16.gmra.mrb[12].mxu1 %v2074_v32 }
  0x68   : > { %838 = vmatprep.mubr.bf16.mxu0 %v2075_v33  ;;  %966 = vmatprep.mubr.bf16.mxu1 %v2077_v34 }
  0x6f   : > { %839 = vmatmul.mubr.bf16.gmra.mrb[16].mxu0 %v2079_v35  ;;  %967 = vmatmul.mubr.bf16.gmra.mrb[16].mxu1 %v2080_v36 }
  0x70   : > { %846 = vmatprep.mubr.bf16.mxu0 %v2081_v37  ;;  %974 = vmatprep.mubr.bf16.mxu1 %v2083_v38 }
  0x77   : > { %847 = vmatmul.mubr.bf16.gmra.mrb[20].mxu0 %v2085_v39  ;;  %975 = vmatmul.mubr.bf16.gmra.mrb[20].mxu1 %v2086_v40 }
  0x78   : > { %854 = vmatprep.mubr.bf16.mxu0 %v2087_v41  ;;  %982 = vmatprep.mubr.bf16.mxu1 %v2089_v42 }
  0x7f   : > { %855 = vmatmul.mubr.bf16.gmra.mrb[24].mxu0 %v2091_v43  ;;  %983 = vmatmul.mubr.bf16.gmra.mrb[24].mxu1 %v2092_v44 }
  0x80   : > { %862 = vmatprep.mubr.bf16.mxu0 %v2093_v45  ;;  %990 = vmatprep.mubr.bf16.mxu1 %v2095_v46 }
  0x87   : > { %863 = vmatmul.mubr.bf16.gmra.mrb[28].mxu0 %v2097_v47  ;;  %991 = vmatmul.mubr.bf16.gmra.mrb[28].mxu1 %v2098_v48 }
  0x88   : > { %870 = vmatprep.mubr.bf16.mxu0 %v2099_v49  ;;  %998 = vmatprep.mubr.bf16.mxu1 %v2101_v50 }
  0x8f   : > { %871 = vmatmul.mubr.bf16.gmra.mrb[32].mxu0 %v2103_v51  ;;  %999 = vmatmul.mubr.bf16.gmra.mrb[32].mxu1 %v2104_v52 }
  0x90   : > { %878 = vmatprep.mubr.bf16.mxu0 %v2105_v53  ;;  %1006 = vmatprep.mubr.bf16.mxu1 %v2107_v54 }
  0x97   : > { %879 = vmatmul.mubr.bf16.gmra.mrb[36].mxu0 %v2109_v55  ;;  %1007 = vmatmul.mubr.bf16.gmra.mrb[36].mxu1 %v2110_v56 }
  0x98   : > { %886 = vmatprep.mubr.bf16.mxu0 %v2111_v57  ;;  %1014 = vmatprep.mubr.bf16.mxu1 %v2113_v58 }
  0x9f   : > { %887 = vmatmul.mubr.bf16.gmra.mrb[40].mxu0 %v2115_v59  ;;  %1015 = vmatmul.mubr.bf16.gmra.mrb[40].mxu1 %v2116_v60 }
  0xa0   : > { %894 = vmatprep.mubr.bf16.mxu0 %v2117_v61  ;;  %1022 = vmatprep.mubr.bf16.mxu1 %v2119_v62 }
  0xa7   : > { %895 = vmatmul.mubr.bf16.gmra.mrb[44].mxu0 %v2121_v63  ;;  %1023 = vmatmul.mubr.bf16.gmra.mrb[44].mxu1 %v2122_v0 }
  0xa8   : > { %902 = vmatprep.mubr.bf16.mxu0 %v2123_v1  ;;  %1030 = vmatprep.mubr.bf16.mxu1 %v2125_v2 }
  0xaf   : > { %903 = vmatmul.mubr.bf16.gmra.mrb[48].mxu0 %v2127_v3  ;;  %1031 = vmatmul.mubr.bf16.gmra.mrb[48].mxu1 %v2128_v4 }
  0xb0   : > { %910 = vmatprep.mubr.bf16.mxu0 %v2129_v5  ;;  %1038 = vmatprep.mubr.bf16.mxu1 %v2131_v6 }
  0xb7   : > { %911 = vmatmul.mubr.bf16.gmra.mrb[52].mxu0 %v2133_v7  ;;  %1039 = vmatmul.mubr.bf16.gmra.mrb[52].mxu1 %v2134_v8 }
  0xb8   : > { %918 = vmatprep.mubr.bf16.mxu0 %v2135_v9  ;;  %1046 = vmatprep.mubr.bf16.mxu1 %v2137_v10 }
  0xbf   : > { %919 = vmatmul.mubr.bf16.gmra.mrb[56].mxu0 %v2139_v11  ;;  %1047 = vmatmul.mubr.bf16.gmra.mrb[56].mxu1 %v2140_v12 }
  0xc0   : > { %926 = vmatprep.mubr.bf16.mxu0 %v2141_v13  ;;  %1054 = vmatprep.mubr.bf16.mxu1 %v2143_v14 }
  0xc7   : > { %927 = vmatmul.mubr.bf16.gmra.mrb[60].mxu0 %v2145_v15  ;;  %1055 = vmatmul.mubr.bf16.gmra.mrb[60].mxu1 %v2146_v16 }
 0x122   : > { %v808_v18 = vpop.f32.mrb[0].mxu0  ;;  %v936_v20 = vpop.f32.mrb[0].mxu1 }
 0x123   : > { %v1070_v21 = vmul.f32 %v2464_v17, %v808_v18  ;;  %v1102_v22 = vmul.f32 %v2464_v17, %v936_v20  ;;  %v810_v23 = vpop.f32.mrb[1].mxu0  ;;  %v938_v24 = vpop.f32.mrb[1].mxu1 }
 0x124   : > { %v811_v25 = vpop.f32.mrb[2].mxu0  ;;  %v939_v26 = vpop.f32.mrb[2].mxu1 }
 0x125   : > { %v1141_v27 = vadd.f32 %v2470_v19, %v1070_v21  ;;  %v1173_v28 = vadd.f32 %v2470_v19, %v1102_v22  ;;  %v1071_v29 = vmul.f32 %v2464_v17, %v811_v25  ;;  %v1103_v30 = vmul.f32 %v2464_v17, %v939_v26  ;;  %v813_v31 = vpop.f32.mrb[3].mxu0  ;;  %v941_v32 = vpop.f32.mrb[3].mxu1 }
 0x127   : > { %v1205_v33 = vmax.f32 %v1141_v27, 0.0  ;;  %v1237_v34 = vmax.f32 %v1173_v28, 0.0  ;;  %v1142_v35 = vadd.f32 %v2470_v19, %v1071_v29  ;;  %v1174_v36 = vadd.f32 %v2470_v19, %v1103_v30 }
 0x129   : > { %v1880_v37 = vpack.c.bf16 %v1205_v33, %v1205_v33  ;;  %v1912_v38 = vpack.c.bf16 %v1237_v34, %v1237_v34  ;;  %v1206_v39 = vmax.f32 %v1142_v35, 0.0  ;;  %v1238_v40 = vmax.f32 %v1174_v36, 0.0 }
 0x12a   : > { %v816_v41 = vpop.f32.mrb[4].mxu0  ;;  %v944_v42 = vpop.f32.mrb[4].mxu1 }
 0x12b   : > { %1526 = vst.msk [vmem:[%s2482_s14] sm:$0xf] %vm1525_vm0, %v1880_v37  ;;  %1558 = vst.msk [vmem:[%s2482_s14 + $0x80] sm:$0xf] %vm1525_vm0, %v1912_v38  ;;  %v1881_v43 = vpack.c.bf16 %v1206_v39, %v1206_v39  ;;  %v1913_v44 = vpack.c.bf16 %v1238_v40, %v1238_v40  ;;  %v1072_v45 = vmul.f32 %v2464_v17, %v816_v41  ;;  %v818_v47 = vpop.f32.mrb[5].mxu0  ;;  %v946_v48 = vpop.f32.mrb[5].mxu1 }
 0x12c   : > { %v1104_v46 = vmul.f32 %v2464_v17, %v944_v42  ;;  %v819_v49 = vpop.f32.mrb[6].mxu0  ;;  %v947_v50 = vpop.f32.mrb[6].mxu1 }
 0x12d   : > { %1527 = vst.msk [vmem:[%s2482_s14 + $0x4] sm:$0xf] %vm1525_vm0, %v1881_v43  ;;  %1559 = vst.msk [vmem:[%s2482_s14 + $0x84] sm:$0xf] %vm1525_vm0, %v1913_v44  ;;  %v1143_v51 = vadd.f32 %v2470_v19, %v1072_v45  ;;  %v1073_v53 = vmul.f32 %v2464_v17, %v819_v49  ;;  %v1105_v54 = vmul.f32 %v2464_v17, %v947_v50  ;;  %v821_v55 = vpop.f32.mrb[7].mxu0  ;;  %v949_v56 = vpop.f32.mrb[7].mxu1 }
 0x12e   : > { %v1175_v52 = vadd.f32 %v2470_v19, %v1104_v46 }
 0x12f   : > { %v1207_v57 = vmax.f32 %v1143_v51, 0.0  ;;  %v1144_v59 = vadd.f32 %v2470_v19, %v1073_v53  ;;  %v1176_v60 = vadd.f32 %v2470_v19, %v1105_v54 }
 0x130   : > { %v1239_v58 = vmax.f32 %v1175_v52, 0.0 }
 0x131   : > { %v1882_v61 = vpack.c.bf16 %v1207_v57, %v1207_v57  ;;  %v1208_v63 = vmax.f32 %v1144_v59, 0.0  ;;  %v1240_v0 = vmax.f32 %v1176_v60, 0.0 }
 0x132   : > { %v1914_v62 = vpack.c.bf16 %v1239_v58, %v1239_v58  ;;  %v824_v1 = vpop.f32.mrb[8].mxu0  ;;  %v952_v2 = vpop.f32.mrb[8].mxu1 }
 0x133   : > { %1528 = vst.msk [vmem:[%s2482_s14 + $0x8] sm:$0xf] %vm1525_vm0, %v1882_v61  ;;  %v1883_v3 = vpack.c.bf16 %v1208_v63, %v1208_v63  ;;  %v1915_v4 = vpack.c.bf16 %v1240_v0, %v1240_v0  ;;  %v1074_v5 = vmul.f32 %v2464_v17, %v824_v1  ;;  %v1106_v6 = vmul.f32 %v2464_v17, %v952_v2  ;;  %v826_v7 = vpop.f32.mrb[9].mxu0  ;;  %v954_v8 = vpop.f32.mrb[9].mxu1 }
 0x134   : > { %1560 = vst.msk [vmem:[%s2482_s14 + $0x88] sm:$0xf] %vm1525_vm0, %v1914_v62  ;;  %v827_v9 = vpop.f32.mrb[10].mxu0  ;;  %v955_v10 = vpop.f32.mrb[10].mxu1 }
 0x135   : > { %1529 = vst.msk [vmem:[%s2482_s14 + $0xc] sm:$0xf] %vm1525_vm0, %v1883_v3  ;;  %1561 = vst.msk [vmem:[%s2482_s14 + $0x8c] sm:$0xf] %vm1525_vm0, %v1915_v4  ;;  %v1145_v11 = vadd.f32 %v2470_v19, %v1074_v5  ;;  %v1177_v12 = vadd.f32 %v2470_v19, %v1106_v6  ;;  %v1075_v13 = vmul.f32 %v2464_v17, %v827_v9  ;;  %v829_v15 = vpop.f32.mrb[11].mxu0  ;;  %v957_v16 = vpop.f32.mrb[11].mxu1 }
 0x136   : > { %v1107_v14 = vmul.f32 %v2464_v17, %v955_v10 }
 0x137   : > { %v1209_v18 = vmax.f32 %v1145_v11, 0.0  ;;  %v1241_v20 = vmax.f32 %v1177_v12, 0.0  ;;  %v1146_v21 = vadd.f32 %v2470_v19, %v1075_v13 }
 0x138   : > { %v1178_v22 = vadd.f32 %v2470_v19, %v1107_v14 }
 0x139   : > { %v1884_v23 = vpack.c.bf16 %v1209_v18, %v1209_v18  ;;  %v1916_v24 = vpack.c.bf16 %v1241_v20, %v1241_v20  ;;  %v1210_v25 = vmax.f32 %v1146_v21, 0.0 }
 0x13a   : > { %v1242_v26 = vmax.f32 %v1178_v22, 0.0  ;;  %v832_v27 = vpop.f32.mrb[12].mxu0  ;;  %v960_v28 = vpop.f32.mrb[12].mxu1 }
 0x13b   : > { %1530 = vst.msk [vmem:[%s2482_s14 + $0x10] sm:$0xf] %vm1525_vm0, %v1884_v23  ;;  %1562 = vst.msk [vmem:[%s2482_s14 + $0x90] sm:$0xf] %vm1525_vm0, %v1916_v24  ;;  %v1885_v29 = vpack.c.bf16 %v1210_v25, %v1210_v25  ;;  %v1076_v31 = vmul.f32 %v2464_v17, %v832_v27  ;;  %v1108_v32 = vmul.f32 %v2464_v17, %v960_v28  ;;  %v834_v33 = vpop.f32.mrb[13].mxu0  ;;  %v962_v34 = vpop.f32.mrb[13].mxu1 }
 0x13c   : > { %v1917_v30 = vpack.c.bf16 %v1242_v26, %v1242_v26  ;;  %v835_v35 = vpop.f32.mrb[14].mxu0  ;;  %v963_v36 = vpop.f32.mrb[14].mxu1 }
 0x13d   : > { %1531 = vst.msk [vmem:[%s2482_s14 + $0x14] sm:$0xf] %vm1525_vm0, %v1885_v29  ;;  %v1147_v37 = vadd.f32 %v2470_v19, %v1076_v31  ;;  %v1179_v38 = vadd.f32 %v2470_v19, %v1108_v32  ;;  %v1077_v39 = vmul.f32 %v2464_v17, %v835_v35  ;;  %v1109_v40 = vmul.f32 %v2464_v17, %v963_v36  ;;  %v837_v41 = vpop.f32.mrb[15].mxu0  ;;  %v965_v42 = vpop.f32.mrb[15].mxu1 }
 0x13e   : > { %1563 = vst.msk [vmem:[%s2482_s14 + $0x94] sm:$0xf] %vm1525_vm0, %v1917_v30 }
 0x13f   : > { %v1211_v43 = vmax.f32 %v1147_v37, 0.0  ;;  %v1243_v44 = vmax.f32 %v1179_v38, 0.0  ;;  %v1148_v45 = vadd.f32 %v2470_v19, %v1077_v39  ;;  %v1180_v46 = vadd.f32 %v2470_v19, %v1109_v40 }
 0x141   : > { %v1886_v47 = vpack.c.bf16 %v1211_v43, %v1211_v43  ;;  %v1918_v48 = vpack.c.bf16 %v1243_v44, %v1243_v44  ;;  %v1212_v49 = vmax.f32 %v1148_v45, 0.0  ;;  %v1244_v50 = vmax.f32 %v1180_v46, 0.0 }
 0x142   : > { %v840_v51 = vpop.f32.mrb[16].mxu0  ;;  %v968_v52 = vpop.f32.mrb[16].mxu1 }
 0x143   : > { %1532 = vst.msk [vmem:[%s2482_s14 + $0x18] sm:$0xf] %vm1525_vm0, %v1886_v47  ;;  %1564 = vst.msk [vmem:[%s2482_s14 + $0x98] sm:$0xf] %vm1525_vm0, %v1918_v48  ;;  %v1887_v53 = vpack.c.bf16 %v1212_v49, %v1212_v49  ;;  %v1919_v54 = vpack.c.bf16 %v1244_v50, %v1244_v50  ;;  %v1078_v55 = vmul.f32 %v2464_v17, %v840_v51  ;;  %v842_v57 = vpop.f32.mrb[17].mxu0  ;;  %v970_v58 = vpop.f32.mrb[17].mxu1 }
 0x144   : > { %v1110_v56 = vmul.f32 %v2464_v17, %v968_v52  ;;  %v843_v59 = vpop.f32.mrb[18].mxu0  ;;  %v971_v60 = vpop.f32.mrb[18].mxu1 }
 0x145   : > { %1533 = vst.msk [vmem:[%s2482_s14 + $0x1c] sm:$0xf] %vm1525_vm0, %v1887_v53  ;;  %1565 = vst.msk [vmem:[%s2482_s14 + $0x9c] sm:$0xf] %vm1525_vm0, %v1919_v54  ;;  %v1149_v61 = vadd.f32 %v2470_v19, %v1078_v55  ;;  %v1079_v63 = vmul.f32 %v2464_v17, %v843_v59  ;;  %v1111_v0 = vmul.f32 %v2464_v17, %v971_v60  ;;  %v845_v1 = vpop.f32.mrb[19].mxu0  ;;  %v973_v2 = vpop.f32.mrb[19].mxu1 }
 0x146   : > { %v1181_v62 = vadd.f32 %v2470_v19, %v1110_v56 }
 0x147   : > { %v1213_v3 = vmax.f32 %v1149_v61, 0.0  ;;  %v1150_v5 = vadd.f32 %v2470_v19, %v1079_v63  ;;  %v1182_v6 = vadd.f32 %v2470_v19, %v1111_v0 }
 0x148   : > { %v1245_v4 = vmax.f32 %v1181_v62, 0.0 }
 0x149   : > { %v1888_v7 = vpack.c.bf16 %v1213_v3, %v1213_v3  ;;  %v1214_v9 = vmax.f32 %v1150_v5, 0.0  ;;  %v1246_v10 = vmax.f32 %v1182_v6, 0.0 }
 0x14a   : > { %v1920_v8 = vpack.c.bf16 %v1245_v4, %v1245_v4  ;;  %v848_v11 = vpop.f32.mrb[20].mxu0  ;;  %v976_v12 = vpop.f32.mrb[20].mxu1 }
 0x14b   : > { %1534 = vst.msk [vmem:[%s2482_s14 + $0x20] sm:$0xf] %vm1525_vm0, %v1888_v7  ;;  %v1889_v13 = vpack.c.bf16 %v1214_v9, %v1214_v9  ;;  %v1921_v14 = vpack.c.bf16 %v1246_v10, %v1246_v10  ;;  %v1080_v15 = vmul.f32 %v2464_v17, %v848_v11  ;;  %v1112_v16 = vmul.f32 %v2464_v17, %v976_v12  ;;  %v850_v18 = vpop.f32.mrb[21].mxu0  ;;  %v978_v20 = vpop.f32.mrb[21].mxu1 }
 0x14c   : > { %1566 = vst.msk [vmem:[%s2482_s14 + $0xa0] sm:$0xf] %vm1525_vm0, %v1920_v8  ;;  %v851_v21 = vpop.f32.mrb[22].mxu0  ;;  %v979_v22 = vpop.f32.mrb[22].mxu1 }
 0x14d   : > { %1535 = vst.msk [vmem:[%s2482_s14 + $0x24] sm:$0xf] %vm1525_vm0, %v1889_v13  ;;  %1567 = vst.msk [vmem:[%s2482_s14 + $0xa4] sm:$0xf] %vm1525_vm0, %v1921_v14  ;;  %v1151_v23 = vadd.f32 %v2470_v19, %v1080_v15  ;;  %v1183_v24 = vadd.f32 %v2470_v19, %v1112_v16  ;;  %v1081_v25 = vmul.f32 %v2464_v17, %v851_v21  ;;  %v853_v27 = vpop.f32.mrb[23].mxu0  ;;  %v981_v28 = vpop.f32.mrb[23].mxu1 }
 0x14e   : > { %v1113_v26 = vmul.f32 %v2464_v17, %v979_v22 }
 0x14f   : > { %v1215_v29 = vmax.f32 %v1151_v23, 0.0  ;;  %v1247_v30 = vmax.f32 %v1183_v24, 0.0  ;;  %v1152_v31 = vadd.f32 %v2470_v19, %v1081_v25 }
 0x150   : > { %v1184_v32 = vadd.f32 %v2470_v19, %v1113_v26 }
 0x151   : > { %v1890_v33 = vpack.c.bf16 %v1215_v29, %v1215_v29  ;;  %v1922_v34 = vpack.c.bf16 %v1247_v30, %v1247_v30  ;;  %v1216_v35 = vmax.f32 %v1152_v31, 0.0 }
 0x152   : > { %v1248_v36 = vmax.f32 %v1184_v32, 0.0  ;;  %v856_v37 = vpop.f32.mrb[24].mxu0  ;;  %v984_v38 = vpop.f32.mrb[24].mxu1 }
 0x153   : > { %1536 = vst.msk [vmem:[%s2482_s14 + $0x28] sm:$0xf] %vm1525_vm0, %v1890_v33  ;;  %1568 = vst.msk [vmem:[%s2482_s14 + $0xa8] sm:$0xf] %vm1525_vm0, %v1922_v34  ;;  %v1891_v39 = vpack.c.bf16 %v1216_v35, %v1216_v35  ;;  %v1082_v41 = vmul.f32 %v2464_v17, %v856_v37  ;;  %v1114_v42 = vmul.f32 %v2464_v17, %v984_v38  ;;  %v858_v43 = vpop.f32.mrb[25].mxu0  ;;  %v986_v44 = vpop.f32.mrb[25].mxu1 }
 0x154   : > { %v1923_v40 = vpack.c.bf16 %v1248_v36, %v1248_v36  ;;  %v859_v45 = vpop.f32.mrb[26].mxu0  ;;  %v987_v46 = vpop.f32.mrb[26].mxu1 }
 0x155   : > { %1537 = vst.msk [vmem:[%s2482_s14 + $0x2c] sm:$0xf] %vm1525_vm0, %v1891_v39  ;;  %v1153_v47 = vadd.f32 %v2470_v19, %v1082_v41  ;;  %v1185_v48 = vadd.f32 %v2470_v19, %v1114_v42  ;;  %v1083_v49 = vmul.f32 %v2464_v17, %v859_v45  ;;  %v1115_v50 = vmul.f32 %v2464_v17, %v987_v46  ;;  %v861_v51 = vpop.f32.mrb[27].mxu0  ;;  %v989_v52 = vpop.f32.mrb[27].mxu1 }
 0x156   : > { %1569 = vst.msk [vmem:[%s2482_s14 + $0xac] sm:$0xf] %vm1525_vm0, %v1923_v40 }
 0x157   : > { %v1217_v53 = vmax.f32 %v1153_v47, 0.0  ;;  %v1249_v54 = vmax.f32 %v1185_v48, 0.0  ;;  %v1154_v55 = vadd.f32 %v2470_v19, %v1083_v49  ;;  %v1186_v56 = vadd.f32 %v2470_v19, %v1115_v50 }
 0x159   : > { %v1892_v57 = vpack.c.bf16 %v1217_v53, %v1217_v53  ;;  %v1924_v58 = vpack.c.bf16 %v1249_v54, %v1249_v54  ;;  %v1218_v59 = vmax.f32 %v1154_v55, 0.0  ;;  %v1250_v60 = vmax.f32 %v1186_v56, 0.0 }
 0x15a   : > { %v864_v61 = vpop.f32.mrb[28].mxu0  ;;  %v992_v62 = vpop.f32.mrb[28].mxu1 }
 0x15b   : > { %1538 = vst.msk [vmem:[%s2482_s14 + $0x30] sm:$0xf] %vm1525_vm0, %v1892_v57  ;;  %1570 = vst.msk [vmem:[%s2482_s14 + $0xb0] sm:$0xf] %vm1525_vm0, %v1924_v58  ;;  %v1893_v63 = vpack.c.bf16 %v1218_v59, %v1218_v59  ;;  %v1925_v0 = vpack.c.bf16 %v1250_v60, %v1250_v60  ;;  %v1084_v1 = vmul.f32 %v2464_v17, %v864_v61  ;;  %v866_v3 = vpop.f32.mrb[29].mxu0  ;;  %v994_v4 = vpop.f32.mrb[29].mxu1 }
 0x15c   : > { %v1116_v2 = vmul.f32 %v2464_v17, %v992_v62  ;;  %v867_v5 = vpop.f32.mrb[30].mxu0  ;;  %v995_v6 = vpop.f32.mrb[30].mxu1 }
 0x15d   : > { %1539 = vst.msk [vmem:[%s2482_s14 + $0x34] sm:$0xf] %vm1525_vm0, %v1893_v63  ;;  %1571 = vst.msk [vmem:[%s2482_s14 + $0xb4] sm:$0xf] %vm1525_vm0, %v1925_v0  ;;  %v1155_v7 = vadd.f32 %v2470_v19, %v1084_v1  ;;  %v1085_v9 = vmul.f32 %v2464_v17, %v867_v5  ;;  %v1117_v10 = vmul.f32 %v2464_v17, %v995_v6  ;;  %v869_v11 = vpop.f32.mrb[31].mxu0  ;;  %v997_v12 = vpop.f32.mrb[31].mxu1 }
 0x15e   : > { %v1187_v8 = vadd.f32 %v2470_v19, %v1116_v2 }
 0x15f   : > { %v1219_v13 = vmax.f32 %v1155_v7, 0.0  ;;  %v1156_v15 = vadd.f32 %v2470_v19, %v1085_v9  ;;  %v1188_v16 = vadd.f32 %v2470_v19, %v1117_v10 }
 0x160   : > { %v1251_v14 = vmax.f32 %v1187_v8, 0.0 }
 0x161   : > { %v1894_v18 = vpack.c.bf16 %v1219_v13, %v1219_v13  ;;  %v1220_v21 = vmax.f32 %v1156_v15, 0.0  ;;  %v1252_v22 = vmax.f32 %v1188_v16, 0.0 }
 0x162   : > { %v1926_v20 = vpack.c.bf16 %v1251_v14, %v1251_v14  ;;  %v872_v23 = vpop.f32.mrb[32].mxu0  ;;  %v1000_v24 = vpop.f32.mrb[32].mxu1 }
 0x163   : > { %1540 = vst.msk [vmem:[%s2482_s14 + $0x38] sm:$0xf] %vm1525_vm0, %v1894_v18  ;;  %v1895_v25 = vpack.c.bf16 %v1220_v21, %v1220_v21  ;;  %v1927_v26 = vpack.c.bf16 %v1252_v22, %v1252_v22  ;;  %v1086_v27 = vmul.f32 %v2464_v17, %v872_v23  ;;  %v1118_v28 = vmul.f32 %v2464_v17, %v1000_v24  ;;  %v874_v29 = vpop.f32.mrb[33].mxu0  ;;  %v1002_v30 = vpop.f32.mrb[33].mxu1 }
 0x164   : > { %1572 = vst.msk [vmem:[%s2482_s14 + $0xb8] sm:$0xf] %vm1525_vm0, %v1926_v20  ;;  %v875_v31 = vpop.f32.mrb[34].mxu0  ;;  %v1003_v32 = vpop.f32.mrb[34].mxu1 }
 0x165   : > { %1541 = vst.msk [vmem:[%s2482_s14 + $0x3c] sm:$0xf] %vm1525_vm0, %v1895_v25  ;;  %1573 = vst.msk [vmem:[%s2482_s14 + $0xbc] sm:$0xf] %vm1525_vm0, %v1927_v26  ;;  %v1157_v33 = vadd.f32 %v2470_v19, %v1086_v27  ;;  %v1189_v34 = vadd.f32 %v2470_v19, %v1118_v28  ;;  %v1087_v35 = vmul.f32 %v2464_v17, %v875_v31  ;;  %v877_v37 = vpop.f32.mrb[35].mxu0  ;;  %v1005_v38 = vpop.f32.mrb[35].mxu1 }
 0x166   : > { %v1119_v36 = vmul.f32 %v2464_v17, %v1003_v32 }
 0x167   : > { %v1221_v39 = vmax.f32 %v1157_v33, 0.0  ;;  %v1253_v40 = vmax.f32 %v1189_v34, 0.0  ;;  %v1158_v41 = vadd.f32 %v2470_v19, %v1087_v35 }
 0x168   : > { %v1190_v42 = vadd.f32 %v2470_v19, %v1119_v36 }
 0x169   : > { %v1896_v43 = vpack.c.bf16 %v1221_v39, %v1221_v39  ;;  %v1928_v44 = vpack.c.bf16 %v1253_v40, %v1253_v40  ;;  %v1222_v45 = vmax.f32 %v1158_v41, 0.0 }
 0x16a   : > { %v1254_v46 = vmax.f32 %v1190_v42, 0.0  ;;  %v880_v47 = vpop.f32.mrb[36].mxu0  ;;  %v1008_v48 = vpop.f32.mrb[36].mxu1 }
 0x16b   : > { %1542 = vst.msk [vmem:[%s2482_s14 + $0x40] sm:$0xf] %vm1525_vm0, %v1896_v43  ;;  %1574 = vst.msk [vmem:[%s2482_s14 + $0xc0] sm:$0xf] %vm1525_vm0, %v1928_v44  ;;  %v1897_v49 = vpack.c.bf16 %v1222_v45, %v1222_v45  ;;  %v1088_v51 = vmul.f32 %v2464_v17, %v880_v47  ;;  %v1120_v52 = vmul.f32 %v2464_v17, %v1008_v48  ;;  %v882_v53 = vpop.f32.mrb[37].mxu0  ;;  %v1010_v54 = vpop.f32.mrb[37].mxu1 }
 0x16c   : > { %v1929_v50 = vpack.c.bf16 %v1254_v46, %v1254_v46  ;;  %v883_v55 = vpop.f32.mrb[38].mxu0  ;;  %v1011_v56 = vpop.f32.mrb[38].mxu1 }
 0x16d   : > { %1543 = vst.msk [vmem:[%s2482_s14 + $0x44] sm:$0xf] %vm1525_vm0, %v1897_v49  ;;  %v1159_v57 = vadd.f32 %v2470_v19, %v1088_v51  ;;  %v1191_v58 = vadd.f32 %v2470_v19, %v1120_v52  ;;  %v1089_v59 = vmul.f32 %v2464_v17, %v883_v55  ;;  %v1121_v60 = vmul.f32 %v2464_v17, %v1011_v56  ;;  %v885_v61 = vpop.f32.mrb[39].mxu0  ;;  %v1013_v62 = vpop.f32.mrb[39].mxu1 }
 0x16e   : > { %1575 = vst.msk [vmem:[%s2482_s14 + $0xc4] sm:$0xf] %vm1525_vm0, %v1929_v50 }
 0x16f   : > { %v1223_v63 = vmax.f32 %v1159_v57, 0.0  ;;  %v1255_v0 = vmax.f32 %v1191_v58, 0.0  ;;  %v1160_v1 = vadd.f32 %v2470_v19, %v1089_v59  ;;  %v1192_v2 = vadd.f32 %v2470_v19, %v1121_v60 }
 0x171   : > { %v1898_v3 = vpack.c.bf16 %v1223_v63, %v1223_v63  ;;  %v1930_v4 = vpack.c.bf16 %v1255_v0, %v1255_v0  ;;  %v1224_v5 = vmax.f32 %v1160_v1, 0.0  ;;  %v1256_v6 = vmax.f32 %v1192_v2, 0.0 }
 0x172   : > { %v888_v7 = vpop.f32.mrb[40].mxu0  ;;  %v1016_v8 = vpop.f32.mrb[40].mxu1 }
 0x173   : > { %1544 = vst.msk [vmem:[%s2482_s14 + $0x48] sm:$0xf] %vm1525_vm0, %v1898_v3  ;;  %1576 = vst.msk [vmem:[%s2482_s14 + $0xc8] sm:$0xf] %vm1525_vm0, %v1930_v4  ;;  %v1899_v9 = vpack.c.bf16 %v1224_v5, %v1224_v5  ;;  %v1931_v10 = vpack.c.bf16 %v1256_v6, %v1256_v6  ;;  %v1090_v11 = vmul.f32 %v2464_v17, %v888_v7  ;;  %v890_v13 = vpop.f32.mrb[41].mxu0  ;;  %v1018_v14 = vpop.f32.mrb[41].mxu1 }
 0x174   : > { %v1122_v12 = vmul.f32 %v2464_v17, %v1016_v8  ;;  %v891_v15 = vpop.f32.mrb[42].mxu0  ;;  %v1019_v16 = vpop.f32.mrb[42].mxu1 }
 0x175   : > { %1545 = vst.msk [vmem:[%s2482_s14 + $0x4c] sm:$0xf] %vm1525_vm0, %v1899_v9  ;;  %1577 = vst.msk [vmem:[%s2482_s14 + $0xcc] sm:$0xf] %vm1525_vm0, %v1931_v10  ;;  %v1161_v18 = vadd.f32 %v2470_v19, %v1090_v11  ;;  %v1091_v21 = vmul.f32 %v2464_v17, %v891_v15  ;;  %v1123_v22 = vmul.f32 %v2464_v17, %v1019_v16  ;;  %v893_v23 = vpop.f32.mrb[43].mxu0  ;;  %v1021_v24 = vpop.f32.mrb[43].mxu1 }
 0x176   : > { %v1193_v20 = vadd.f32 %v2470_v19, %v1122_v12 }
 0x177   : > { %v1225_v25 = vmax.f32 %v1161_v18, 0.0  ;;  %v1162_v27 = vadd.f32 %v2470_v19, %v1091_v21  ;;  %v1194_v28 = vadd.f32 %v2470_v19, %v1123_v22 }
 0x178   : > { %v1257_v26 = vmax.f32 %v1193_v20, 0.0 }
 0x179   : > { %v1900_v29 = vpack.c.bf16 %v1225_v25, %v1225_v25  ;;  %v1226_v31 = vmax.f32 %v1162_v27, 0.0  ;;  %v1258_v32 = vmax.f32 %v1194_v28, 0.0 }
 0x17a   : > { %v1932_v30 = vpack.c.bf16 %v1257_v26, %v1257_v26  ;;  %v896_v33 = vpop.f32.mrb[44].mxu0  ;;  %v1024_v34 = vpop.f32.mrb[44].mxu1 }
 0x17b   : > { %1546 = vst.msk [vmem:[%s2482_s14 + $0x50] sm:$0xf] %vm1525_vm0, %v1900_v29  ;;  %v1901_v35 = vpack.c.bf16 %v1226_v31, %v1226_v31  ;;  %v1933_v36 = vpack.c.bf16 %v1258_v32, %v1258_v32  ;;  %v1092_v37 = vmul.f32 %v2464_v17, %v896_v33  ;;  %v1124_v38 = vmul.f32 %v2464_v17, %v1024_v34  ;;  %v898_v39 = vpop.f32.mrb[45].mxu0  ;;  %v1026_v40 = vpop.f32.mrb[45].mxu1 }
 0x17c   : > { %1578 = vst.msk [vmem:[%s2482_s14 + $0xd0] sm:$0xf] %vm1525_vm0, %v1932_v30  ;;  %v899_v41 = vpop.f32.mrb[46].mxu0  ;;  %v1027_v42 = vpop.f32.mrb[46].mxu1 }
 0x17d   : > { %1547 = vst.msk [vmem:[%s2482_s14 + $0x54] sm:$0xf] %vm1525_vm0, %v1901_v35  ;;  %1579 = vst.msk [vmem:[%s2482_s14 + $0xd4] sm:$0xf] %vm1525_vm0, %v1933_v36  ;;  %v1163_v43 = vadd.f32 %v2470_v19, %v1092_v37  ;;  %v1195_v44 = vadd.f32 %v2470_v19, %v1124_v38  ;;  %v1093_v45 = vmul.f32 %v2464_v17, %v899_v41  ;;  %v901_v47 = vpop.f32.mrb[47].mxu0  ;;  %v1029_v48 = vpop.f32.mrb[47].mxu1 }
 0x17e   : > { %v1125_v46 = vmul.f32 %v2464_v17, %v1027_v42 }
 0x17f   : > { %v1227_v49 = vmax.f32 %v1163_v43, 0.0  ;;  %v1259_v50 = vmax.f32 %v1195_v44, 0.0  ;;  %v1164_v51 = vadd.f32 %v2470_v19, %v1093_v45 }
 0x180   : > { %v1196_v52 = vadd.f32 %v2470_v19, %v1125_v46 }
 0x181   : > { %v1902_v53 = vpack.c.bf16 %v1227_v49, %v1227_v49  ;;  %v1934_v54 = vpack.c.bf16 %v1259_v50, %v1259_v50  ;;  %v1228_v55 = vmax.f32 %v1164_v51, 0.0 }
 0x182   : > { %v1260_v56 = vmax.f32 %v1196_v52, 0.0  ;;  %v904_v57 = vpop.f32.mrb[48].mxu0  ;;  %v1032_v58 = vpop.f32.mrb[48].mxu1 }
 0x183   : > { %1548 = vst.msk [vmem:[%s2482_s14 + $0x58] sm:$0xf] %vm1525_vm0, %v1902_v53  ;;  %1580 = vst.msk [vmem:[%s2482_s14 + $0xd8] sm:$0xf] %vm1525_vm0, %v1934_v54  ;;  %v1903_v59 = vpack.c.bf16 %v1228_v55, %v1228_v55  ;;  %v1094_v61 = vmul.f32 %v2464_v17, %v904_v57  ;;  %v1126_v62 = vmul.f32 %v2464_v17, %v1032_v58  ;;  %v906_v63 = vpop.f32.mrb[49].mxu0  ;;  %v1034_v0 = vpop.f32.mrb[49].mxu1 }
 0x184   : > { %v1935_v60 = vpack.c.bf16 %v1260_v56, %v1260_v56  ;;  %v907_v1 = vpop.f32.mrb[50].mxu0  ;;  %v1035_v2 = vpop.f32.mrb[50].mxu1 }
 0x185   : > { %1549 = vst.msk [vmem:[%s2482_s14 + $0x5c] sm:$0xf] %vm1525_vm0, %v1903_v59  ;;  %v1165_v3 = vadd.f32 %v2470_v19, %v1094_v61  ;;  %v1197_v4 = vadd.f32 %v2470_v19, %v1126_v62  ;;  %v1095_v5 = vmul.f32 %v2464_v17, %v907_v1  ;;  %v1127_v6 = vmul.f32 %v2464_v17, %v1035_v2  ;;  %v909_v7 = vpop.f32.mrb[51].mxu0  ;;  %v1037_v8 = vpop.f32.mrb[51].mxu1 }
 0x186   : > { %1581 = vst.msk [vmem:[%s2482_s14 + $0xdc] sm:$0xf] %vm1525_vm0, %v1935_v60 }
 0x187   : > { %v1229_v9 = vmax.f32 %v1165_v3, 0.0  ;;  %v1261_v10 = vmax.f32 %v1197_v4, 0.0  ;;  %v1166_v11 = vadd.f32 %v2470_v19, %v1095_v5  ;;  %v1198_v12 = vadd.f32 %v2470_v19, %v1127_v6 }
 0x189   : > { %v1904_v13 = vpack.c.bf16 %v1229_v9, %v1229_v9  ;;  %v1936_v14 = vpack.c.bf16 %v1261_v10, %v1261_v10  ;;  %v1230_v15 = vmax.f32 %v1166_v11, 0.0  ;;  %v1262_v16 = vmax.f32 %v1198_v12, 0.0 }
 0x18a   : > { %v912_v18 = vpop.f32.mrb[52].mxu0  ;;  %v1040_v20 = vpop.f32.mrb[52].mxu1 }
 0x18b   : > { %1550 = vst.msk [vmem:[%s2482_s14 + $0x60] sm:$0xf] %vm1525_vm0, %v1904_v13  ;;  %1582 = vst.msk [vmem:[%s2482_s14 + $0xe0] sm:$0xf] %vm1525_vm0, %v1936_v14  ;;  %v1905_v21 = vpack.c.bf16 %v1230_v15, %v1230_v15  ;;  %v1937_v22 = vpack.c.bf16 %v1262_v16, %v1262_v16  ;;  %v1096_v23 = vmul.f32 %v2464_v17, %v912_v18  ;;  %v914_v25 = vpop.f32.mrb[53].mxu0  ;;  %v1042_v26 = vpop.f32.mrb[53].mxu1 }
 0x18c   : > { %v1128_v24 = vmul.f32 %v2464_v17, %v1040_v20  ;;  %v915_v27 = vpop.f32.mrb[54].mxu0  ;;  %v1043_v28 = vpop.f32.mrb[54].mxu1 }
 0x18d   : > { %1551 = vst.msk [vmem:[%s2482_s14 + $0x64] sm:$0xf] %vm1525_vm0, %v1905_v21  ;;  %1583 = vst.msk [vmem:[%s2482_s14 + $0xe4] sm:$0xf] %vm1525_vm0, %v1937_v22  ;;  %v1167_v29 = vadd.f32 %v2470_v19, %v1096_v23  ;;  %v1097_v31 = vmul.f32 %v2464_v17, %v915_v27  ;;  %v1129_v32 = vmul.f32 %v2464_v17, %v1043_v28  ;;  %v917_v33 = vpop.f32.mrb[55].mxu0  ;;  %v1045_v34 = vpop.f32.mrb[55].mxu1 }
 0x18e   : > { %v1199_v30 = vadd.f32 %v2470_v19, %v1128_v24 }
 0x18f   : > { %v1231_v35 = vmax.f32 %v1167_v29, 0.0  ;;  %v1168_v37 = vadd.f32 %v2470_v19, %v1097_v31  ;;  %v1200_v38 = vadd.f32 %v2470_v19, %v1129_v32 }
 0x190   : > { %v1263_v36 = vmax.f32 %v1199_v30, 0.0 }
 0x191   : > { %v1906_v39 = vpack.c.bf16 %v1231_v35, %v1231_v35  ;;  %v1232_v41 = vmax.f32 %v1168_v37, 0.0  ;;  %v1264_v42 = vmax.f32 %v1200_v38, 0.0 }
 0x192   : > { %v1938_v40 = vpack.c.bf16 %v1263_v36, %v1263_v36  ;;  %v920_v43 = vpop.f32.mrb[56].mxu0  ;;  %v1048_v44 = vpop.f32.mrb[56].mxu1 }
 0x193   : > { %1552 = vst.msk [vmem:[%s2482_s14 + $0x68] sm:$0xf] %vm1525_vm0, %v1906_v39  ;;  %v1907_v45 = vpack.c.bf16 %v1232_v41, %v1232_v41  ;;  %v1939_v46 = vpack.c.bf16 %v1264_v42, %v1264_v42  ;;  %v1098_v47 = vmul.f32 %v2464_v17, %v920_v43  ;;  %v1130_v48 = vmul.f32 %v2464_v17, %v1048_v44  ;;  %v922_v49 = vpop.f32.mrb[57].mxu0  ;;  %v1050_v50 = vpop.f32.mrb[57].mxu1 }
 0x194   : > { %1584 = vst.msk [vmem:[%s2482_s14 + $0xe8] sm:$0xf] %vm1525_vm0, %v1938_v40  ;;  %v923_v51 = vpop.f32.mrb[58].mxu0  ;;  %v1051_v52 = vpop.f32.mrb[58].mxu1 }
 0x195   : > { %1553 = vst.msk [vmem:[%s2482_s14 + $0x6c] sm:$0xf] %vm1525_vm0, %v1907_v45  ;;  %1585 = vst.msk [vmem:[%s2482_s14 + $0xec] sm:$0xf] %vm1525_vm0, %v1939_v46  ;;  %v1169_v53 = vadd.f32 %v2470_v19, %v1098_v47  ;;  %v1201_v54 = vadd.f32 %v2470_v19, %v1130_v48  ;;  %v1099_v55 = vmul.f32 %v2464_v17, %v923_v51  ;;  %v925_v57 = vpop.f32.mrb[59].mxu0  ;;  %v1053_v58 = vpop.f32.mrb[59].mxu1 }
 0x196   : > { %v1131_v56 = vmul.f32 %v2464_v17, %v1051_v52 }
 0x197   : > { %v1233_v59 = vmax.f32 %v1169_v53, 0.0  ;;  %v1265_v60 = vmax.f32 %v1201_v54, 0.0  ;;  %v1170_v61 = vadd.f32 %v2470_v19, %v1099_v55 }
 0x198   : > { %v1202_v62 = vadd.f32 %v2470_v19, %v1131_v56 }
 0x199   : > { %v1908_v63 = vpack.c.bf16 %v1233_v59, %v1233_v59  ;;  %v1940_v0 = vpack.c.bf16 %v1265_v60, %v1265_v60  ;;  %v1234_v1 = vmax.f32 %v1170_v61, 0.0 }
 0x19a   : > { %v1266_v2 = vmax.f32 %v1202_v62, 0.0  ;;  %v928_v3 = vpop.f32.mrb[60].mxu0  ;;  %v1056_v4 = vpop.f32.mrb[60].mxu1 }
 0x19b   : > { %1554 = vst.msk [vmem:[%s2482_s14 + $0x70] sm:$0xf] %vm1525_vm0, %v1908_v63  ;;  %1586 = vst.msk [vmem:[%s2482_s14 + $0xf0] sm:$0xf] %vm1525_vm0, %v1940_v0  ;;  %v1909_v5 = vpack.c.bf16 %v1234_v1, %v1234_v1  ;;  %v1100_v7 = vmul.f32 %v2464_v17, %v928_v3  ;;  %v1132_v8 = vmul.f32 %v2464_v17, %v1056_v4  ;;  %v930_v9 = vpop.f32.mrb[61].mxu0  ;;  %v1058_v10 = vpop.f32.mrb[61].mxu1 }
 0x19c   : > { %v1941_v6 = vpack.c.bf16 %v1266_v2, %v1266_v2  ;;  %v931_v11 = vpop.f32.mrb[62].mxu0  ;;  %v1059_v12 = vpop.f32.mrb[62].mxu1 }
 0x19d   : > { %1555 = vst.msk [vmem:[%s2482_s14 + $0x74] sm:$0xf] %vm1525_vm0, %v1909_v5  ;;  %v1171_v13 = vadd.f32 %v2470_v19, %v1100_v7  ;;  %v1203_v14 = vadd.f32 %v2470_v19, %v1132_v8  ;;  %v1101_v15 = vmul.f32 %v2464_v17, %v931_v11  ;;  %v1133_v16 = vmul.f32 %v2464_v17, %v1059_v12  ;;  %v933_v18 = vpop.f32.mrb[63].mxu0  ;;  %v1061_v20 = vpop.f32.mrb[63].mxu1 }
 0x19e   : > { %1587 = vst.msk [vmem:[%s2482_s14 + $0xf4] sm:$0xf] %vm1525_vm0, %v1941_v6 }
 0x19f   : > { %v1235_v21 = vmax.f32 %v1171_v13, 0.0  ;;  %v1267_v22 = vmax.f32 %v1203_v14, 0.0  ;;  %v1172_v23 = vadd.f32 %v2470_v19, %v1101_v15  ;;  %v1204_v24 = vadd.f32 %v2470_v19, %v1133_v16 }
 0x1a1   : > { %v1910_v25 = vpack.c.bf16 %v1235_v21, %v1235_v21  ;;  %v1942_v26 = vpack.c.bf16 %v1267_v22, %v1267_v22  ;;  %v1236_v27 = vmax.f32 %v1172_v23, 0.0  ;;  %v1268_v28 = vmax.f32 %v1204_v24, 0.0 }
 0x1a3   : > { %1556 = vst.msk [vmem:[%s2482_s14 + $0x78] sm:$0xf] %vm1525_vm0, %v1910_v25  ;;  %1588 = vst.msk [vmem:[%s2482_s14 + $0xf8] sm:$0xf] %vm1525_vm0, %v1942_v26  ;;  %v1911_v17 = vpack.c.bf16 %v1236_v27, %v1236_v27  ;;  %v1943_v19 = vpack.c.bf16 %v1268_v28, %v1268_v28 }
 0x1a5   : > { %1557 = vst.msk [vmem:[%s2482_s14 + $0x7c] sm:$0xf] %vm1525_vm0, %v1911_v17  ;;  %1589 = vst.msk [vmem:[%s2482_s14 + $0xfc] sm:$0xf] %vm1525_vm0, %v1943_v19 }
 0x1a6   : > { %2160 = shalt.err (!%p2157_p5)
}
 0x1a7   : > { %s2161_s9 = scalar_lea.hbm %s2729_s30, 4096  ;;  %s2165_s12 = scalar_lea.hbm %s2793_s4, 405504 }
 0x1a8   : > { %p2162_p6 = scmp.ne.s32.totalorder %s2729_s30, %s2161_s9  ;;  %p2166_p10 = scmp.lt.u32.totalorder %s2729_s30, %s2793_s4 }
 0x1a9   : > { %p2167_p11 = scmp.lt.u32.totalorder %s2165_s12, %s2161_s9  ;;  %p2169_p13 = scmp.lt.u32.totalorder %s2161_s9, %s2729_s30 }
 0x1aa   : > { %p2163_p7 = pnand %p2162_p6, %p2296_p4 }
 0x1ab   : > { %p2168_p12 = por %p2167_p11, %p2166_p10 }
 0x1ac   : > { %p2164_p9 = pneg %p2163_p7 }
 0x1ad   : > { %p2170_p0 = por %p2169_p13, %p2168_p12 }
 0x1af   : > { %p2171_p1 = pnand %p2170_p0, %p2164_p9 }
 0x1b1   : > { %2174 = shalt.err (!%p2171_p1)
}
 0x1b2   : > { %s2229_s14 = smov 64   ;;  %s2230_s21 = smov 4  }
 0x1b3   : > { %1977 = dma.vmem_to_hbm [thread:$0]  (%p2296_p4), %s2731_s22, 4096, %s2729_s30, %s2743_s18, %s2229_s14, %s2229_s14, %s2230_s21  }
 0x1b4 PF: > { %p1983_p2 = scmp.ge.s32.totalorder %s2225_s20, 2  ;;  %s1620_s26 = sand.u32 1, %s2205_s15  }
 0x1b5   : > { %s1621_s29 = scalar_lea.sflag [#allocation3], %s1620_s26 }
 0x1b6   : > { %p1980_p3 = pnand %p1983_p2, %p2303_p8 }
 0x1b8   : > { %2200 = dma.done.wait (!%p1980_p3), %s1621_s29, 4096  }
 0x1b9   : > { %2202 = vsyncadd (!%p1980_p3), %s1621_s29, 4294963200  ;;  %s17_s20 = sadd.s32 1, %s2225_s20   ;;  %s2796_s15 = smov %s2209_s16 }
 0x1ba   : > { %p14_p5 = scmp.ge.s32.totalorder %s17_s20, 101   ;;  %s2797_s16 = smov %s2213_s17 }
 0x1bb   : > { %s2798_s17 = smov %s2309_s28  ;;  %s2799_s18 = smov %s2221_s19 }
 0x1bc   : > { %s2800_s19 = smov %s2802_s23  ;;  %16 = sbr.rel (!%p14_p5) target bundleno = 4 (0x4), region = 80 }
 0x1c3   :  { %1626 = vsyncpa [#allocation3], 1 }
 0x1c4   :  { %1628 = vsyncpa [#allocation3 + $0x1], 1 }

</bundles_post_ra>
